<compile_context>
chip_gen: v7x
topology: tpu7x:2x2x1
jax: 0.10.0
libtpu: 0.0.40
codegen_flags: <defaults>
</compile_context>

<pallas_src>
import functools

import jax
import jax.numpy as jnp
from jax.experimental import pallas as pl
from jax.experimental.pallas import tpu as pltpu

HIDDEN = 32           # GConvGRU(node_features, 32, 1)


# ----------------------------------------------------------------------------
# Kernel
# ----------------------------------------------------------------------------
def _gconvgru_attack_kernel(
    x_ref, h_ref, y_ref,                       # per-node streamed blocks
    wx_ref, wh_ref, bg_ref,                    # fused gate weights / bias (bf16/f32)
    whh_ref,                                   # conv_h_h weight (acts on H*R), bf16
    wl1_ref, bl1_ref, wl2_ref, bl2_ref,        # labels MLP (bf16 weights, f32 bias)
    wtail_ref, bdiff_ref,                      # fused head+combine logit-diff column
    out_ref,
):
    f32 = jnp.float32
    bf16 = jnp.bfloat16
    hdn = HIDDEN

    # Streams may be f32 (default) or bf16 (caller opt-in); elementwise math f32.
    H = h_ref[...].astype(f32)                 # (T, 32)
    x_b = x_ref[...].astype(bf16)              # (T, F)  MXU operand
    y_b = y_ref[...].astype(bf16)              # (T, C)  MXU operand
    H_b = H.astype(bf16)

    def mm(a_bf16, w_ref):
        # bf16 MXU operands (weights pre-cast in pack_params), f32 accumulation.
        return jnp.dot(a_bf16, w_ref[...], preferred_element_type=f32)

    # --- GConvGRU cell (ChebConv K=1 == dense Linear; graph term unused) -----
    # One wide matmul per streamed operand; output columns = [z | r | x-part of h~].
    # TODO(synk): K>1 Chebyshev graph propagation (sparse edge gather/scatter) is
    # not implemented; the module fixes K=1 where it is mathematically absent.
    pre = mm(x_b, wx_ref) + mm(H_b, wh_ref) + bg_ref[...]        # (T, 96) f32
    zr = jax.nn.sigmoid(pre[:, : 2 * hdn])                       # fused z/r sigmoid
    z = zr[:, :hdn]
    r = zr[:, hdn:]
    h_tilde = jnp.tanh(pre[:, 2 * hdn:] + mm((H * r).astype(bf16), whh_ref))
    h_new = z * H + (1.0 - z) * h_tilde

    # --- head: relu -> (Linear(32,C) folded into the combine difference) -----
    h_act = jnp.maximum(h_new, 0.0)

    # --- labels MLP: Linear(C,32) -> ReLU -> Linear(32,C) -> ReLU ------------
    y1 = jnp.maximum(mm(y_b, wl1_ref) + bl1_ref[...], 0.0)
    y2 = jnp.maximum(mm(y1.astype(bf16), wl2_ref) + bl2_ref[...], 0.0)

    # --- fused combine + 2-class softmax == sigmoid(logit0 - logit1) (exact) -
    tail_in = jnp.concatenate([h_act, y2], axis=-1).astype(bf16)   # (T, 32+C)
    diff = mm(tail_in, wtail_ref) + bdiff_ref[...]                 # (T, 1)
    p0 = jax.nn.sigmoid(diff)
    out_ref[...] = jnp.concatenate([p0, 1.0 - p0], axis=-1)        # single store


# ----------------------------------------------------------------------------
# Parameters
# ----------------------------------------------------------------------------
def init_params(key, node_features, num_classes, hidden=HIDDEN):
    """Module-shaped parameters (stored (in, out) so matmuls are x @ W)."""
    def uni(k, shape, fan_in):
        bound = 1.0 / (float(fan_in) ** 0.5)
        return jax.random.uniform(k, shape, jnp.float32, -bound, bound)

    ks = iter(jax.random.split(key, 32))
    p = {}
    for g in ("z", "r", "h"):
        p[f"w_x{g}"] = uni(next(ks), (node_features, hidden), node_features)
        p[f"b_x{g}"] = uni(next(ks), (hidden,), node_features)
        p[f"w_h{g}"] = uni(next(ks), (hidden, hidden), hidden)
        p[f"b_h{g}"] = uni(next(ks), (hidden,), hidden)
    p["w_lin"] = uni(next(ks), (hidden, num_classes), hidden)
    p["b_lin"] = uni(next(ks), (num_classes,), hidden)
    p["w_l1"] = uni(next(ks), (num_classes, hidden), num_classes)
    p["b_l1"] = uni(next(ks), (hidden,), num_classes)
    p["w_l2"] = uni(next(ks), (hidden, num_classes), hidden)
    p["b_l2"] = uni(next(ks), (num_classes,), hidden)
    p["w_c"] = uni(next(ks), (2 * num_classes, 2), 2 * num_classes)
    p["b_c"] = uni(next(ks), (2,), 2 * num_classes)
    return p


def pack_params(p, node_features, num_classes, hidden=HIDDEN):
    """Pack module params into fused kernel operands (exact reassociation).

    Weight matrices are pre-cast to bf16 (the kernel fed them to the MXU as bf16
    already, so this is exact w.r.t. the previous kernel); biases stay f32.
    """
    del node_features
    f32 = jnp.float32
    bf16 = jnp.bfloat16
    C, Hd = num_classes, hidden

    # Column-fused gate weights; output columns = [z | r | x-part-of-h_tilde].
    w_x = jnp.concatenate([p["w_xz"], p["w_xr"], p["w_xh"]], axis=1)       # (F, 3H)
    w_h = jnp.concatenate(
        [p["w_hz"], p["w_hr"], jnp.zeros((Hd, Hd), f32)], axis=1)          # (H, 3H)
    b_g = jnp.concatenate(
        [p["b_xz"] + p["b_hz"], p["b_xr"] + p["b_hr"], p["b_xh"] + p["b_hh"]]
    ).reshape(1, 3 * Hd)

    # Fold Linear(32,C) and the (2C,2) combine into one logit-difference column:
    # softmax over 2 classes == sigmoid(l0 - l1).  Row-stack the h-part and the
    # y-part so the kernel needs a single width-1 MXU op on cat(h_act, y2).
    wc_h, wc_y = p["w_c"][:C], p["w_c"][C:]
    d_h = wc_h[:, 0:1] - wc_h[:, 1:2]                                      # (C, 1)
    d_y = wc_y[:, 0:1] - wc_y[:, 1:2]                                      # (C, 1)
    w_head = p["w_lin"] @ d_h                                              # (H, 1)
    w_tail = jnp.concatenate([w_head, d_y], axis=0)                        # (H+C, 1)
    b_diff = (p["b_lin"].reshape(1, C) @ d_h
              + (p["b_c"][0] - p["b_c"][1])).reshape(1, 1)

    return {
        "w_x": w_x.astype(bf16), "w_h": w_h.astype(bf16), "b_g": b_g,
        "w_hh": p["w_hh"].astype(bf16),
        "w_l1": p["w_l1"].astype(bf16), "b_l1": p["b_l1"].reshape(1, Hd),
        "w_l2": p["w_l2"].astype(bf16), "b_l2": p["b_l2"].reshape(1, C),
        "w_tail": w_tail.astype(bf16), "b_diff": b_diff,
    }


# ----------------------------------------------------------------------------
# pallas_call wrapper
# ----------------------------------------------------------------------------
def _round_up(n, m):
    return ((n + m - 1) // m) * m


@functools.lru_cache(maxsize=1)
def _tpu_tile_config():
    """Generation-aware (tile_n, vmem_limit_bytes).

    v5e/v6e have 128 MiB VMEM per TensorCore -> big tiles + raised scoped limit.
    v7x has only 64 MiB per TC -> cap the tile and the limit.
    """
    vmem = 64 * 1024 * 1024                      # conservative (v7x-sized) fallback
    try:
        info = pltpu.get_tpu_info()
        vmem = int(getattr(info, "vmem_capacity_bytes", vmem))
    except Exception:
        pass
    if vmem >= 100 * 1024 * 1024:                # v5e / v6e
        return 6144, 96 * 1024 * 1024
    return 4096, 48 * 1024 * 1024                # v7x


@functools.partial(jax.jit, static_argnames=("tile_n", "vmem_limit"))
def _run_kernel(kp, x, y, h0, tile_n, vmem_limit):
    n, f = x.shape
    c = y.shape[1]
    hdn = HIDDEN
    grid = (pl.cdiv(n, tile_n),)

    def row_spec(width):
        return pl.BlockSpec((tile_n, width), lambda i: (i, 0))

    def whole(a):   # full-array block, constant index -> fetched once, stays resident
        return pl.BlockSpec(a.shape, lambda i: (0, 0))

    weights = (kp["w_x"], kp["w_h"], kp["b_g"], kp["w_hh"],
               kp["w_l1"], kp["b_l1"], kp["w_l2"], kp["b_l2"],
               kp["w_tail"], kp["b_diff"])
    operands = (x, h0, y) + weights
    in_specs = [row_spec(f), row_spec(hdn), row_spec(c)] + [whole(w) for w in weights]

    flops = 2 * n * (f * 3 * hdn + hdn * 3 * hdn + hdn * hdn
                     + c * hdn + hdn * c + (hdn + c))
    transcendentals = n * (3 * hdn + 1)
    stream_bytes = sum(int(a.size) * a.dtype.itemsize for a in (x, h0, y)) + n * 2 * 4
    weight_bytes = sum(int(w.size) * w.dtype.itemsize for w in weights)

    return pl.pallas_call(
        _gconvgru_attack_kernel,
        out_shape=jax.ShapeDtypeStruct((n, 2), jnp.float32),
        grid=grid,
        in_specs=in_specs,
        out_specs=row_spec(2),
        compiler_params=pltpu.CompilerParams(
            dimension_semantics=("parallel",),   # shards node tiles across TCs on v7x
            vmem_limit_bytes=vmem_limit,
        ),
        cost_estimate=pl.CostEstimate(
            flops=flops, transcendentals=transcendentals,
            bytes_accessed=stream_bytes + weight_bytes),
    )(*operands)


def gconvgru_attack_forward(params, x, y, edge_index, edge_weight, H=None,
                            hidden=HIDDEN, tile_n=None):
    """Mirrors GConvGRU_Attack.forward(x, y, edge_index, edge_weight, H)."""
    # ChebConv with K=1 never uses the propagation term -> edges are no-ops.
    del edge_index, edge_weight
    n = x.shape[0]
    h0 = H if H is not None else jnp.zeros((n, hidden), jnp.float32)
    cfg_tile, vmem_limit = _tpu_tile_config()
    if tile_n is None:
        tile_n = min(cfg_tile, _round_up(n, 8))
    kp = pack_params(params, x.shape[1], y.shape[1], hidden)
    probs = _run_kernel(kp, x, y, h0, tile_n, vmem_limit)
    return probs, H   # PyTorch module returns the *input* H unchanged.


# ----------------------------------------------------------------------------
# Demo / self-check
# ----------------------------------------------------------------------------
if __name__ == "__main__":
    NODES, NODE_FEATURES, NUM_CLASSES, EDGES = 8, 4, 3, 16

    key = jax.random.PRNGKey(0)
    k_param, k_x, k_y, k_ei, k_ew, k_h = jax.random.split(key, 6)

    params = init_params(k_param, NODE_FEATURES, NUM_CLASSES)

    x = jax.random.normal(k_x, (NODES, NODE_FEATURES), jnp.float32)
    y = jax.random.normal(k_y, (NODES, NUM_CLASSES), jnp.float32)
    edge_index = jax.random.randint(k_ei, (2, EDGES), 0, NODES, dtype=jnp.int32)
    edge_weight = jax.random.uniform(k_ew, (EDGES,), jnp.float32)

    # Small-shape run (single tile), H=None path.
    probs, H_out = gconvgru_attack_forward(params, x, y, edge_index, edge_weight, H=None)
    probs = jax.block_until_ready(probs)
    assert probs.shape == (NODES, 2)
    assert bool(jnp.all(jnp.isfinite(probs)))
    assert bool(jnp.allclose(jnp.sum(probs, axis=1), 1.0, atol=1e-5))
    assert H_out is None

    # Larger run exercising the node grid (multiple tiles + remainder) and H != None.
    N_BIG = 2500
    xb = jax.random.normal(k_x, (N_BIG, NODE_FEATURES), jnp.float32)
    yb = jax.random.normal(k_y, (N_BIG, NUM_CLASSES), jnp.float32)
    Hb = 0.1 * jax.random.normal(k_h, (N_BIG, HIDDEN), jnp.float32)
    probs_b, Hb_out = gconvgru_attack_forward(params, xb, yb, edge_index, edge_weight,
                                              H=Hb, tile_n=1024)
    probs_b = jax.block_until_ready(probs_b)
    assert probs_b.shape == (N_BIG, 2)
    assert bool(jnp.all(jnp.isfinite(probs_b)))
    assert bool(jnp.allclose(jnp.sum(probs_b, axis=1), 1.0, atol=1e-5))
    assert Hb_out is Hb

    # Same inputs through the default (generation-aware large) tile config; results
    # must be independent of the tiling.
    probs_b2, _ = gconvgru_attack_forward(params, xb, yb, edge_index, edge_weight, H=Hb)
    probs_b2 = jax.block_until_ready(probs_b2)
    assert bool(jnp.allclose(probs_b, probs_b2, atol=1e-5))

    print("KERNEL_OK")
</pallas_src>

<mosaic_0001>
module attributes {stable_mosaic.version = 11 : i64} {
  func.func @_gconvgru_attack_kernel(%arg0: i32, %arg1: memref<8x4xf32, #tpu.memory_space<vmem>>, %arg2: memref<8x32xf32, #tpu.memory_space<vmem>>, %arg3: memref<8x3xf32, #tpu.memory_space<vmem>>, %arg4: memref<4x96xbf16, #tpu.memory_space<vmem>>, %arg5: memref<32x96xbf16, #tpu.memory_space<vmem>>, %arg6: memref<1x96xf32, #tpu.memory_space<vmem>>, %arg7: memref<32x32xbf16, #tpu.memory_space<vmem>>, %arg8: memref<3x32xbf16, #tpu.memory_space<vmem>>, %arg9: memref<1x32xf32, #tpu.memory_space<vmem>>, %arg10: memref<32x3xbf16, #tpu.memory_space<vmem>>, %arg11: memref<1x3xf32, #tpu.memory_space<vmem>>, %arg12: memref<35x1xbf16, #tpu.memory_space<vmem>>, %arg13: memref<1x1xf32, #tpu.memory_space<vmem>>, %arg14: memref<8x2xf32, #tpu.memory_space<vmem>>) attributes {dimension_semantics = [#tpu.dimension_semantics<parallel>], iteration_bounds = array<i64: 1>, scalar_prefetch = 0 : i64, scratch_operands = 0 : i64, tpu.core_type = #tpu.core_type<tc>, window_params = [{transform_indices = @transform_0, window_bounds = array<i64: 8, 4>}, {transform_indices = @transform_1, window_bounds = array<i64: 8, 32>}, {transform_indices = @transform_2, window_bounds = array<i64: 8, 3>}, {pipeline_mode = #tpu.pipeline_mode<synchronous>, transform_indices = @transform_3, window_bounds = array<i64: 4, 96>}, {pipeline_mode = #tpu.pipeline_mode<synchronous>, transform_indices = @transform_4, window_bounds = array<i64: 32, 96>}, {pipeline_mode = #tpu.pipeline_mode<synchronous>, transform_indices = @transform_5, window_bounds = array<i64: 1, 96>}, {pipeline_mode = #tpu.pipeline_mode<synchronous>, transform_indices = @transform_6, window_bounds = array<i64: 32, 32>}, {pipeline_mode = #tpu.pipeline_mode<synchronous>, transform_indices = @transform_7, window_bounds = array<i64: 3, 32>}, {pipeline_mode = #tpu.pipeline_mode<synchronous>, transform_indices = @transform_8, window_bounds = array<i64: 1, 32>}, {pipeline_mode = #tpu.pipeline_mode<synchronous>, transform_indices = @transform_9, window_bounds = array<i64: 32, 3>}, {pipeline_mode = #tpu.pipeline_mode<synchronous>, transform_indices = @transform_10, window_bounds = array<i64: 1, 3>}, {pipeline_mode = #tpu.pipeline_mode<synchronous>, transform_indices = @transform_11, window_bounds = array<i64: 35, 1>}, {pipeline_mode = #tpu.pipeline_mode<synchronous>, transform_indices = @transform_12, window_bounds = array<i64: 1, 1>}, {transform_indices = @transform_13, window_bounds = array<i64: 8, 2>}]} {
    %c0 = arith.constant 0 : index
    %c0_0 = arith.constant 0 : index
    %0 = vector.load %arg2[%c0, %c0_0] : memref<8x32xf32, #tpu.memory_space<vmem>>, vector<8x32xf32>
    %c0_1 = arith.constant 0 : index
    %c0_2 = arith.constant 0 : index
    %1 = vector.load %arg1[%c0_1, %c0_2] : memref<8x4xf32, #tpu.memory_space<vmem>>, vector<8x4xf32>
    %2 = arith.truncf %1 : vector<8x4xf32> to vector<8x4xbf16>
    %c0_3 = arith.constant 0 : index
    %c0_4 = arith.constant 0 : index
    %3 = vector.load %arg3[%c0_3, %c0_4] : memref<8x3xf32, #tpu.memory_space<vmem>>, vector<8x3xf32>
    %4 = arith.truncf %3 : vector<8x3xf32> to vector<8x3xbf16>
    %5 = arith.truncf %0 : vector<8x32xf32> to vector<8x32xbf16>
    %c0_5 = arith.constant 0 : index
    %c0_6 = arith.constant 0 : index
    %6 = vector.load %arg4[%c0_5, %c0_6] : memref<4x96xbf16, #tpu.memory_space<vmem>>, vector<4x96xbf16>
    %cst = arith.constant dense<0.000000e+00> : vector<8x96xf32>
    %7 = tpu.matmul %2, %6, %cst {dimension_numbers = #tpu.dot_dimension_numbers<[1], [0], [0], [1], [0, 0, 1, 1], [], []>} : vector<8x4xbf16>, vector<4x96xbf16>, vector<8x96xf32> -> vector<8x96xf32>
    %c0_7 = arith.constant 0 : index
    %c0_8 = arith.constant 0 : index
    %8 = vector.load %arg5[%c0_7, %c0_8] : memref<32x96xbf16, #tpu.memory_space<vmem>>, vector<32x96xbf16>
    %cst_9 = arith.constant dense<0.000000e+00> : vector<8x96xf32>
    %9 = tpu.matmul %5, %8, %cst_9 {dimension_numbers = #tpu.dot_dimension_numbers<[1], [0], [0], [1], [0, 0, 1, 1], [], []>} : vector<8x32xbf16>, vector<32x96xbf16>, vector<8x96xf32> -> vector<8x96xf32>
    %10 = arith.addf %7, %9 : vector<8x96xf32>
    %c0_10 = arith.constant 0 : index
    %c0_11 = arith.constant 0 : index
    %11 = vector.load %arg6[%c0_10, %c0_11] : memref<1x96xf32, #tpu.memory_space<vmem>>, vector<1x96xf32>
    %12 = vector.broadcast %11 : vector<1x96xf32> to vector<8x96xf32>
    %13 = arith.addf %10, %12 : vector<8x96xf32>
    %14 = vector.extract_strided_slice %13 {offsets = [0, 0], sizes = [8, 64], strides = [1, 1]} : vector<8x96xf32> to vector<8x64xf32>
    %15 = arith.negf %14 : vector<8x64xf32>
    %16 = math.exp %15 : vector<8x64xf32>
    %cst_12 = arith.constant 1.000000e+00 : f32
    %17 = vector.broadcast %cst_12 : f32 to vector<8x64xf32>
    %18 = arith.addf %17, %16 : vector<8x64xf32>
    %19 = arith.divf %17, %18 : vector<8x64xf32>
    %20 = vector.extract_strided_slice %19 {offsets = [0, 0], sizes = [8, 32], strides = [1, 1]} : vector<8x64xf32> to vector<8x32xf32>
    %21 = vector.extract_strided_slice %19 {offsets = [0, 32], sizes = [8, 32], strides = [1, 1]} : vector<8x64xf32> to vector<8x32xf32>
    %22 = vector.extract_strided_slice %13 {offsets = [0, 64], sizes = [8, 32], strides = [1, 1]} : vector<8x96xf32> to vector<8x32xf32>
    %23 = arith.mulf %0, %21 : vector<8x32xf32>
    %24 = arith.truncf %23 : vector<8x32xf32> to vector<8x32xbf16>
    %c0_13 = arith.constant 0 : index
    %c0_14 = arith.constant 0 : index
    %25 = vector.load %arg7[%c0_13, %c0_14] : memref<32x32xbf16, #tpu.memory_space<vmem>>, vector<32x32xbf16>
    %cst_15 = arith.constant dense<0.000000e+00> : vector<8x32xf32>
    %26 = tpu.matmul %24, %25, %cst_15 {dimension_numbers = #tpu.dot_dimension_numbers<[1], [0], [0], [1], [0, 0, 1, 1], [], []>} : vector<8x32xbf16>, vector<32x32xbf16>, vector<8x32xf32> -> vector<8x32xf32>
    %27 = arith.addf %22, %26 : vector<8x32xf32>
    %28 = math.tanh %27 : vector<8x32xf32>
    %29 = arith.mulf %20, %0 : vector<8x32xf32>
    %cst_16 = arith.constant 1.000000e+00 : f32
    %30 = vector.broadcast %cst_16 : f32 to vector<8x32xf32>
    %31 = arith.subf %30, %20 : vector<8x32xf32>
    %32 = arith.mulf %31, %28 : vector<8x32xf32>
    %33 = arith.addf %29, %32 : vector<8x32xf32>
    %cst_17 = arith.constant 0.000000e+00 : f32
    %34 = vector.broadcast %cst_17 : f32 to vector<8x32xf32>
    %35 = arith.maximumf %33, %34 : vector<8x32xf32>
    %c0_18 = arith.constant 0 : index
    %c0_19 = arith.constant 0 : index
    %36 = vector.load %arg8[%c0_18, %c0_19] : memref<3x32xbf16, #tpu.memory_space<vmem>>, vector<3x32xbf16>
    %cst_20 = arith.constant dense<0.000000e+00> : vector<8x32xf32>
    %37 = tpu.matmul %4, %36, %cst_20 {dimension_numbers = #tpu.dot_dimension_numbers<[1], [0], [0], [1], [0, 0, 1, 1], [], []>} : vector<8x3xbf16>, vector<3x32xbf16>, vector<8x32xf32> -> vector<8x32xf32>
    %c0_21 = arith.constant 0 : index
    %c0_22 = arith.constant 0 : index
    %38 = vector.load %arg9[%c0_21, %c0_22] : memref<1x32xf32, #tpu.memory_space<vmem>>, vector<1x32xf32>
    %39 = vector.broadcast %38 : vector<1x32xf32> to vector<8x32xf32>
    %40 = arith.addf %37, %39 : vector<8x32xf32>
    %cst_23 = arith.constant 0.000000e+00 : f32
    %41 = vector.broadcast %cst_23 : f32 to vector<8x32xf32>
    %42 = arith.maximumf %40, %41 : vector<8x32xf32>
    %43 = arith.truncf %42 : vector<8x32xf32> to vector<8x32xbf16>
    %c0_24 = arith.constant 0 : index
    %c0_25 = arith.constant 0 : index
    %44 = vector.load %arg10[%c0_24, %c0_25] : memref<32x3xbf16, #tpu.memory_space<vmem>>, vector<32x3xbf16>
    %cst_26 = arith.constant dense<0.000000e+00> : vector<8x3xf32>
    %45 = tpu.matmul %43, %44, %cst_26 {dimension_numbers = #tpu.dot_dimension_numbers<[1], [0], [0], [1], [0, 0, 1, 1], [], []>} : vector<8x32xbf16>, vector<32x3xbf16>, vector<8x3xf32> -> vector<8x3xf32>
    %c0_27 = arith.constant 0 : index
    %c0_28 = arith.constant 0 : index
    %46 = vector.load %arg11[%c0_27, %c0_28] : memref<1x3xf32, #tpu.memory_space<vmem>>, vector<1x3xf32>
    %47 = vector.broadcast %46 : vector<1x3xf32> to vector<8x3xf32>
    %48 = arith.addf %45, %47 : vector<8x3xf32>
    %cst_29 = arith.constant 0.000000e+00 : f32
    %49 = vector.broadcast %cst_29 : f32 to vector<8x3xf32>
    %50 = arith.maximumf %48, %49 : vector<8x3xf32>
    %51 = tpu.concatenate %35, %50 in 1 : vector<8x32xf32>, vector<8x3xf32> -> vector<8x35xf32>
    %52 = arith.truncf %51 : vector<8x35xf32> to vector<8x35xbf16>
    %c0_30 = arith.constant 0 : index
    %c0_31 = arith.constant 0 : index
    %53 = vector.load %arg12[%c0_30, %c0_31] : memref<35x1xbf16, #tpu.memory_space<vmem>>, vector<35x1xbf16>
    %cst_32 = arith.constant dense<0.000000e+00> : vector<8x1xf32>
    %54 = tpu.matmul %52, %53, %cst_32 {dimension_numbers = #tpu.dot_dimension_numbers<[1], [0], [0], [1], [0, 0, 1, 1], [], []>} : vector<8x35xbf16>, vector<35x1xbf16>, vector<8x1xf32> -> vector<8x1xf32>
    %c0_33 = arith.constant 0 : index
    %c0_34 = arith.constant 0 : index
    %55 = vector.load %arg13[%c0_33, %c0_34] : memref<1x1xf32, #tpu.memory_space<vmem>>, vector<1x1xf32>
    %56 = vector.broadcast %55 : vector<1x1xf32> to vector<8x1xf32>
    %57 = arith.addf %54, %56 : vector<8x1xf32>
    %58 = arith.negf %57 : vector<8x1xf32>
    %59 = math.exp %58 : vector<8x1xf32>
    %cst_35 = arith.constant 1.000000e+00 : f32
    %60 = vector.broadcast %cst_35 : f32 to vector<8x1xf32>
    %61 = arith.addf %60, %59 : vector<8x1xf32>
    %62 = arith.divf %60, %61 : vector<8x1xf32>
    %cst_36 = arith.constant 1.000000e+00 : f32
    %63 = vector.broadcast %cst_36 : f32 to vector<8x1xf32>
    %64 = arith.subf %63, %62 : vector<8x1xf32>
    %65 = tpu.concatenate %62, %64 in 1 : vector<8x1xf32>, vector<8x1xf32> -> vector<8x2xf32>
    %c0_37 = arith.constant 0 : index
    %c0_38 = arith.constant 0 : index
    %66 = vector.load %arg14[%c0_37, %c0_38] : memref<8x2xf32, #tpu.memory_space<vmem>>, vector<8x2xf32>
    tpu.vector_store %arg14[%c0_37, %c0_38], %65 {strides = array<i32>} : memref<8x2xf32, #tpu.memory_space<vmem>>, vector<8x2xf32>,
    return
  }
  func.func @transform_0(%arg0: i32) -> (i32, i32) {
    %c0_i32 = arith.constant 0 : i32
    %c0_i32_0 = arith.constant 0 : i32
    return %arg0, %c0_i32 : i32, i32
  }
  func.func @transform_1(%arg0: i32) -> (i32, i32) {
    %c0_i32 = arith.constant 0 : i32
    %c0_i32_0 = arith.constant 0 : i32
    return %arg0, %c0_i32 : i32, i32
  }
  func.func @transform_2(%arg0: i32) -> (i32, i32) {
    %c0_i32 = arith.constant 0 : i32
    %c0_i32_0 = arith.constant 0 : i32
    return %arg0, %c0_i32 : i32, i32
  }
  func.func @transform_3(%arg0: i32) -> (i32, i32) {
    %c0_i32 = arith.constant 0 : i32
    %c0_i32_0 = arith.constant 0 : i32
    %c0_i32_1 = arith.constant 0 : i32
    return %c0_i32, %c0_i32_0 : i32, i32
  }
  func.func @transform_4(%arg0: i32) -> (i32, i32) {
    %c0_i32 = arith.constant 0 : i32
    %c0_i32_0 = arith.constant 0 : i32
    %c0_i32_1 = arith.constant 0 : i32
    return %c0_i32, %c0_i32_0 : i32, i32
  }
  func.func @transform_5(%arg0: i32) -> (i32, i32) {
    %c0_i32 = arith.constant 0 : i32
    %c0_i32_0 = arith.constant 0 : i32
    %c0_i32_1 = arith.constant 0 : i32
    return %c0_i32, %c0_i32_0 : i32, i32
  }
  func.func @transform_6(%arg0: i32) -> (i32, i32) {
    %c0_i32 = arith.constant 0 : i32
    %c0_i32_0 = arith.constant 0 : i32
    %c0_i32_1 = arith.constant 0 : i32
    return %c0_i32, %c0_i32_0 : i32, i32
  }
  func.func @transform_7(%arg0: i32) -> (i32, i32) {
    %c0_i32 = arith.constant 0 : i32
    %c0_i32_0 = arith.constant 0 : i32
    %c0_i32_1 = arith.constant 0 : i32
    return %c0_i32, %c0_i32_0 : i32, i32
  }
  func.func @transform_8(%arg0: i32) -> (i32, i32) {
    %c0_i32 = arith.constant 0 : i32
    %c0_i32_0 = arith.constant 0 : i32
    %c0_i32_1 = arith.constant 0 : i32
    return %c0_i32, %c0_i32_0 : i32, i32
  }
  func.func @transform_9(%arg0: i32) -> (i32, i32) {
    %c0_i32 = arith.constant 0 : i32
    %c0_i32_0 = arith.constant 0 : i32
    %c0_i32_1 = arith.constant 0 : i32
    return %c0_i32, %c0_i32_0 : i32, i32
  }
  func.func @transform_10(%arg0: i32) -> (i32, i32) {
    %c0_i32 = arith.constant 0 : i32
    %c0_i32_0 = arith.constant 0 : i32
    %c0_i32_1 = arith.constant 0 : i32
    return %c0_i32, %c0_i32_0 : i32, i32
  }
  func.func @transform_11(%arg0: i32) -> (i32, i32) {
    %c0_i32 = arith.constant 0 : i32
    %c0_i32_0 = arith.constant 0 : i32
    %c0_i32_1 = arith.constant 0 : i32
    return %c0_i32, %c0_i32_0 : i32, i32
  }
  func.func @transform_12(%arg0: i32) -> (i32, i32) {
    %c0_i32 = arith.constant 0 : i32
    %c0_i32_0 = arith.constant 0 : i32
    %c0_i32_1 = arith.constant 0 : i32
    return %c0_i32, %c0_i32_0 : i32, i32
  }
  func.func @transform_13(%arg0: i32) -> (i32, i32) {
    %c0_i32 = arith.constant 0 : i32
    %c0_i32_0 = arith.constant 0 : i32
    return %arg0, %c0_i32 : i32, i32
  }
}

</mosaic_0001>

<bundles_post_ra>
// kernel: _run_kernel.1
= control target key start
LH: loop header
LB: loop body
LE: loop exit
PB: predicated region body
PF: predicated region fallthrough
CT: control target
= control target key end

     0   :  { %vm118_vm0 = vcmask 1041408   ;;  %vm268_vm1 = vcmask 1040384   ;;  %v592_v0 = vmov 0.0   ;;  %v593_v2 = vmov 65535   ;;  %s765_s4 = inlined_call_operand.vmem [shape: bf16[32,96], index: 4, kind: input, shape index: {}]   ;;  %s766_s3 = inlined_call_operand.vmem [shape: bf16[4,96], index: 3, kind: input, shape index: {}]   ;;  %s767_s7 = inlined_call_operand.vmem [shape: bf16[3,32], index: 7, kind: input, shape index: {}]   ;;  %s768_s11 = inlined_call_operand.vmem [shape: bf16[35,1], index: 11, kind: input, shape index: {}]   ;;  %s769_s0 = inlined_call_operand.vmem [shape: f32[8,4], index: 0, kind: input, shape index: {}]   ;;  %s770_s1 = inlined_call_operand.vmem [shape: f32[8,32], index: 1, kind: input, shape index: {}]   ;;  %s771_s2 = inlined_call_operand.vmem [shape: f32[8,3], index: 2, kind: input, shape index: {}]   ;;  %s772_s6 = inlined_call_operand.vmem [shape: bf16[32,32], index: 6, kind: input, shape index: {}]   ;;  %s773_s5 = inlined_call_operand.vmem [shape: f32[1,96], index: 5, kind: input, shape index: {}]   ;;  %s774_s9 = inlined_call_operand.vmem [shape: bf16[32,3], index: 9, kind: input, shape index: {}]   ;;  %s775_s8 = inlined_call_operand.vmem [shape: f32[1,32], index: 8, kind: input, shape index: {}]   ;;  %s776_s10 = inlined_call_operand.vmem [shape: f32[1,3], index: 10, kind: input, shape index: {}]   ;;  %s777_s12 = inlined_call_operand.<no memory space> [shape: f32[1,1], index: 12, kind: input, shape index: {}]   ;;  %s778_s13 = inlined_call_operand.vmem [shape: f32[8,2], index: 13, kind: output, shape index: {}]  }
   0x1   :  { %520 = vmatprep.subr.bf16.mxu0 %v592_v0  ;;  %v573_v1 = vld [vmem:[%s765_s4] sm:$0xff]   ;;  %528 = vmatprep.subr.bf16.mxu1 %v592_v0  ;;  %v269_v3 = vsel %vm268_vm1, 4294967295, %v593_v2  ;;  %vm594_vm2 = vmmov 0   ;;  %v575_v8 = vld [vmem:[%s765_s4 + $0x8] sm:$0xff]   ;;  %vm114_vm3 = vcmask 31744   ;;  %vm70_vm4 = vcmask 261120  }
   0x2   :  { %v53_v4 = vld [vmem:[%s766_s3] sm:$0x3]  ;;  %521 = vmatpush3.bf16.msra.mxu0 %v573_v1  ;;  %530 = vmatprep.mubr.msk.bf16.mxu1 %vm594_vm2, %v592_v0  ;;  %v684_v7 = vsel %vm118_vm0, %v269_v3, 0  ;;  %vm264_vm5 = vcmask 23552   ;;  %v577_v31 = vld [vmem:[%s772_s6 + $0x8] sm:$0xff]   ;;  %v18_v62 = vstv %s777_s12  ;;  %vm416_vm6 = vcmask 285696  }
   0x3   :  { %v120_v5 = vsel %vm118_vm0, %v53_v4, 0  ;;  %v256_v6 = vld [vmem:[%s767_s7] sm:$0x3]  ;;  %522 = vmatprep.subr.bf16.mxu0 %v592_v0  ;;  %524 = vmatprep.mubr.msk.bf16.mxu0 %vm594_vm2, %v592_v0  ;;  %v579_v44 = vld [vmem:[%s774_s9 + $0x8] sm:$0xff]   ;;  %19 = vst [vmem:[#allocation2] sm:$0x1] %v18_v62 }
   0x4   :  { %529 = vmatpush3.bf16.msra.mxu1 %v120_v5  ;;  %v48_v9 = vld [vmem:[%s769_s0] sm:$0xff]  ;;  %v272_v13 = vand.u32 %v684_v7, %v256_v6  ;;  %v574_v55 = vld [vmem:[%s768_s11 + $0x10] ss:$0 sps:$4 sm:$0x33]   ;;  %v581_v58 = vld [vmem:[%s768_s11 + $0x8] sm:$0xff]   ;;  %vm474_vm7 = vcmask 7168  }
   0x5   :  { %v698_v10 = vld [vmem:[%s770_s1] sm:$0xff]  ;;  %534 = vmatprep.subr.bf16.mxu1 %v592_v0  ;;  %v49_v11 = vpack.c.bf16 %v48_v9, %v48_v9  ;;  %v421_v59 = vand.u32 %v574_v55, %v684_v7  ;;  %vm476_vm8 = vcmask 15360  }
   0x6   :  { %v52_v12 = vpack.c.bf16 %v698_v10, %v698_v10  ;;  %523 = vmatpush3.bf16.msra.mxu0 %v575_v8  ;;  %v50_v14 = vld [vmem:[%s771_s2] sm:$0xff] }
   0x7   :  { %531 = vmatmul.mubr.msk.bf16.vlgmr.msra.gmra.mrb[0].mxu1 %vm114_vm3, %v49_v11  ;;  %542 = vmatprep.subr.bf16.mxu0 %v592_v0  ;;  %v51_v15 = vpack.c.bf16 %v50_v14, %v50_v14  ;;  %v576_v16 = vld [vmem:[%s772_s6] sm:$0xff]  }
   0x8   :  { %538 = vmatprep.mubr.msk.bf16.mxu1 %vm594_vm2, %v592_v0  ;;  %535 = vmatpush3.bf16.msra.mxu1 %v576_v16  ;;  %v486_v21 = vld [vmem:[%s773_s5] ss:$0 sm:$0xff]  ;;  %s595_s5 = smov 96  }
   0x9   :  { %525 = vmatmul.mubr.msk.bf16.vlgmr.msra.gmra.mrb[0].mxu0 %vm70_vm4, %v52_v12  ;;  %536 = vmatprep.subr.bf16.mxu1 %v592_v0  ;;  %v491_v37 = vld [vmem:[%s775_s8] ss:$0 sm:$0xff]  ;;  %s596_s8 = smov 64  }
   0xa   :  { %543 = vmatpush3.bf16.msra.mxu0 %v272_v13  ;;  %544 = vmatprep.mubr.msk.bf16.mxu0 %vm594_vm2, %v592_v0  ;;  %v578_v41 = vld [vmem:[%s774_s9] sm:$0xff]  }
   0xb   :  { %556 = vmatprep.subr.bf16.mxu0 %v592_v0  ;;  %v580_v50 = vld [vmem:[%s768_s11] sm:$0xff]   ;;  %s597_s11 = smov 32  }
   0xc   :  { %537 = vmatpush3.bf16.msra.mxu1 %v577_v31  ;;  %v493_v60 = vld [vmem:[%s776_s10] ss:$0 sm:$0xff]  ;;  %s598_s10 = smov 1  }
   0xd   :  { %548 = vmatprep.subr.bf16.mxu1 %v592_v0  ;;  %v497_v11 = vld [vmem:[#allocation2] ss:$0 sm:$0xff] }
  0x11   :  { %545 = vmatmul.mubr.msk.bf16.vlgmr.msra.gmra.mrb[4].mxu0 %vm264_vm5, %v51_v15 }
  0x12   :  { %562 = vmatprep.mubr.msk.bf16.mxu0 %vm594_vm2, %v592_v0  ;;  %557 = vmatpush3.bf16.msra.mxu0 %v580_v50 }
  0x13   :  { %558 = vmatprep.subr.bf16.mxu0 %v592_v0 }
  0x16   :  { %559 = vmatpush3.bf16.msra.mxu0 %v581_v58 }
  0x17   :  { %560 = vmatprep.subr.bf16.mxu0 %v592_v0 }
  0x1a   :  { %561 = vmatpush3.bf16.msra.mxu0 %v421_v59 }
  0xda   :  { %v156_v17 = vpop.f32.mrb[0].mxu1 }
  0xdb   :  { %v532_v18 = vpop.f32.mrb[1].mxu1 }
  0xdc   :  { %v159_v19 = vpop.f32.mrb[2].mxu1  ;;  %v108_v20 = vpop.f32.mrb[0].mxu0 }
  0xdd   :  { %v157_v22 = vadd.f32 %v156_v17, %v108_v20  ;;  %v533_v23 = vpop.f32.mrb[3].mxu1  ;;  %v526_v24 = vpop.f32.mrb[1].mxu0 }
  0xde   :  { %v111_v25 = vpop.f32.mrb[2].mxu0 }
  0xdf   :  { %v169_v26 = vadd.f32 %v486_v21, %v157_v22  ;;  %v527_v27 = vpop.f32.mrb[3].mxu0 }
  0xe1   :  { %v487_v28 = vmul.f32 -1.442695, %v169_v26 }
  0xe3   :  { %582 = vpow2.f32 %v487_v28 }
  0xe4   :  { %v308_v33 = vpop.f32.mrb[4].mxu0 }
  0xe5   :  { %v546_v34 = vpop.f32.mrb[5].mxu0  ;;  %v309_v40 = vadd.f32 %v491_v37, %v308_v33 }
  0xe6   :  { %v311_v35 = vpop.f32.mrb[6].mxu0 }
  0xe7   :  { %v547_v36 = vpop.f32.mrb[7].mxu0  ;;  %v314_v43 = vmax.f32 %v309_v40, 0.0 }
  0xe9   :  { %v315_v45 = vpack.c.bf16 %v314_v43, %v314_v43 }
  0xed   :  { %v583_v29 = vpop.eup %582 }
  0xee   :  { %v173_v30 = vadd.f32 1.0, %v583_v29 }
  0xf0   :  { %584 = vrcp.f32 %v173_v30 }
  0xfa   :  { %v585_v32 = vpop.eup %584 }
  0xfb   :  { %177 = vrot.lane.b32.xlu0 %v585_v32, %s595_s5  ;;  %v248_v2 = vsub.f32 1.0, %v585_v32 }
 0x16d   :  { %v178_v38 = vpop.permute.xlu0 %177 }
 0x16e   :  { %v180_v39 = vmul.f32 %v178_v38, %v698_v10 }
 0x170   :  { %v181_v42 = vpack.c.bf16 %v180_v39, %v180_v39 }
 0x172   :  { %539 = vmatmul.mubr.msk.bf16.vlgmr.msra.gmra.mrb[4].mxu1 %vm70_vm4, %v181_v42 }
 0x173   :  { %549 = vmatpush3.bf16.msra.mxu1 %v578_v41  ;;  %552 = vmatprep.mubr.msk.bf16.mxu1 %vm594_vm2, %v592_v0 }
 0x174   :  { %550 = vmatprep.subr.bf16.mxu1 %v592_v0  ;;  %v247_v0 = vmul.f32 %v585_v32, %v698_v10 }
 0x177   :  { %551 = vmatpush3.bf16.msra.mxu1 %v579_v44 }
 0x17a   :  { %553 = vmatmul.mubr.msk.bf16.vlgmr.msra.gmra.mrb[8].mxu1 %vm70_vm4, %v315_v45 }
 0x245   :  { %v235_v46 = vpop.f32.mrb[4].mxu1 }
 0x246   :  { %242 = vrot.lane.b32.xlu0 %v235_v46, %s596_s8  ;;  %v540_v47 = vpop.f32.mrb[5].mxu1 }
 0x247   :  { %v238_v48 = vpop.f32.mrb[6].mxu1 }
 0x248   :  { %v541_v49 = vpop.f32.mrb[7].mxu1 }
 0x24d   :  { %v376_v51 = vpop.f32.mrb[8].mxu1 }
 0x24e   :  { %v554_v52 = vpop.f32.mrb[9].mxu1  ;;  %v377_v61 = vadd.f32 %v493_v60, %v376_v51 }
 0x24f   :  { %v379_v53 = vpop.f32.mrb[10].mxu1 }
 0x250   :  { %v555_v54 = vpop.f32.mrb[11].mxu1  ;;  %v382_v1 = vmax.f32 %v377_v61, 0.0 }
 0x2b8   :  { %v243_v56 = vpop.permute.xlu0 %242 }
 0x2b9   :  { %v245_v57 = vadd.f32 %v243_v56, %v169_v26 }
 0x2bb   :  { %586 = vtanh.f32 %v245_v57 }
 0x2c5   :  { %v587_v63 = vpop.eup %586 }
 0x2c6   :  { %250 = vrot.lane.b32.xlu1 %v587_v63, %s596_s8 }
 0x2ca   :  { %384 = vrot.lane.b32.xlu1 %v382_v1, %s597_s11 }
 0x338   :  { %v251_v3 = vpop.permute.xlu1 %250 }
 0x339   :  { %v253_v4 = vmul.f32 %v251_v3, %v248_v2 }
 0x33b   :  { %v254_v5 = vadd.f32 %v253_v4, %v247_v0 }
 0x33c   :  { %v385_v6 = vpop.permute.xlu1 %384 }
 0x33d   :  { %v255_v7 = vmax.f32 %v254_v5, 0.0 }
 0x33f   :  { %v387_v8 = vsel %vm70_vm4, %v255_v7, %v385_v6 }
 0x340   :  { %v388_v9 = vpack.c.bf16 %v387_v8, %v387_v8 }
 0x342   :  { %563 = vmatmul.mubr.msk.bf16.vlgmr.msra.gmra.mrb[8].mxu0 %vm416_vm6, %v388_v9 }
 0x415   :  { %v457_v12 = vpop.f32.mrb[8].mxu0 }
 0x416   :  { %v458_v13 = vadd.f32 %v497_v11, %v457_v12  ;;  %v564_v14 = vpop.f32.mrb[9].mxu0 }
 0x417   :  { %v460_v15 = vpop.f32.mrb[10].mxu0 }
 0x418   :  { %v502_v16 = vmul.f32 -1.442695, %v458_v13  ;;  %v565_v17 = vpop.f32.mrb[11].mxu0 }
 0x41a   :  { %588 = vpow2.f32 %v502_v16 }
 0x424   :  { %v589_v18 = vpop.eup %588 }
 0x425   :  { %v466_v19 = vadd.f32 1.0, %v589_v18 }
 0x427   :  { %590 = vrcp.f32 %v466_v19 }
 0x431   :  { %v591_v10 = vpop.eup %590 }
 0x432   :  { %v469_v20 = vsub.f32 1.0, %v591_v10 }
 0x434   :  { %471 = vrot.lane.b32.xlu0 %v469_v20, %s598_s10 }
 0x4a6   :  { %v472_v21 = vpop.permute.xlu0 %471 }
 0x4a7   :  { %v475_v22 = vsel %vm474_vm7, %v591_v10, %v472_v21 }
 0x4a8   :  { %477 = vst.msk [vmem:[%s778_s13] sm:$0xff] %vm476_vm8, %v475_v22 }

</bundles_post_ra>
